<compile_context>
chip_gen: v5e
topology: v5e:2x2
jax: 0.10.0
libtpu: 0.0.40
codegen_flags: <defaults>
</compile_context>

<pallas_src>
import functools

import jax
import jax.numpy as jnp
from jax.experimental import pallas as pl
from jax.experimental.pallas import tpu as pltpu

_MiB = 1024 * 1024


def _round_up(x, m):
    return ((x + m - 1) // m) * m


def _chip_info():
    """Returns (generation, physical VMEM bytes) with safe fallbacks."""
    phys_vmem = None
    try:
        info = pltpu.get_tpu_info()
        phys_vmem = getattr(info, "vmem_capacity_bytes", None)
    except Exception:
        phys_vmem = None
    kind = ""
    try:
        kind = jax.devices()[0].device_kind.lower()
    except Exception:
        kind = ""
    gen = 0
    for g in (7, 6, 5, 4):
        if f"v{g}" in kind:
            gen = g
            break
    if not phys_vmem:
        phys_vmem = (128 * _MiB) if gen in (4, 5, 6) else (64 * _MiB)
    return gen, int(phys_vmem)


def _vmem_cap(phys_vmem):
    # v5e/v6e: 128 MiB physical -> allow up to ~100 MiB scoped.
    # v7x-class (64 MiB physical per TC) -> stay near ~52 MiB.
    if phys_vmem >= 96 * _MiB:
        return 100 * _MiB
    return min(52 * _MiB, max(24 * _MiB, phys_vmem - 12 * _MiB))


def _gelu_f32(h, use_tanh):
    if use_tanh:
        # tanh approximation -> EUP slot (otherwise idle under the MXU).
        c = jnp.float32(0.7978845608028654)  # sqrt(2/pi)
        return 0.5 * h * (1.0 + jnp.tanh(c * (h + jnp.float32(0.044715) * h * h * h)))
    # Exact erf GELU, matching PyTorch nn.GELU() default.
    return 0.5 * h * (1.0 + jax.lax.erf(h * jnp.float32(0.7071067811865476)))


# ------------------------------ kernels --------------------------------------

def _ffn_kernel_resident(x_ref, w1_ref, b1_ref, w2_ref, b2_ref, o_ref, *,
                         use_tanh_gelu):
    # grid = (Mp//tm,). W1/W2 have a constant block index -> DMA'd once,
    # VMEM-resident for the whole call. No reduction axis, no scratch.
    h = jnp.dot(x_ref[...], w1_ref[...], preferred_element_type=jnp.float32)
    h = h + b1_ref[...].astype(jnp.float32)
    h = _gelu_f32(h, use_tanh_gelu)
    out = jnp.dot(h.astype(w2_ref.dtype), w2_ref[...],
                  preferred_element_type=jnp.float32)
    o_ref[...] = (out + b2_ref[...].astype(jnp.float32)).astype(o_ref.dtype)


def _ffn_kernel_streamed(x_ref, w1_ref, b1_ref, w2_ref, b2_ref, o_ref,
                         *scratch, use_tanh_gelu):
    # grid = (Mp//tm [parallel], Hp//th [arbitrary, last]). Weight slabs are
    # streamed per step. f32 output: accumulate directly into o_ref (resident
    # across k). Other dtypes: f32 VMEM scratch accumulator.
    k = pl.program_id(1)
    acc_ref = scratch[0] if scratch else o_ref

    @pl.when(k == 0)
    def _init():
        acc_ref[...] = jnp.zeros_like(acc_ref)

    h = jnp.dot(x_ref[...], w1_ref[...], preferred_element_type=jnp.float32)
    h = h + b1_ref[...].astype(jnp.float32)
    h = _gelu_f32(h, use_tanh_gelu)
    acc_ref[...] += jnp.dot(h.astype(w2_ref.dtype), w2_ref[...],
                            preferred_element_type=jnp.float32)

    @pl.when(k == pl.num_programs(1) - 1)
    def _finalize():
        if scratch:
            o_ref[...] = (acc_ref[...] + b2_ref[...].astype(jnp.float32)
                          ).astype(o_ref.dtype)
        else:
            o_ref[...] = o_ref[...] + b2_ref[...].astype(jnp.float32)


# --------------------------- VMEM budgeting ----------------------------------

def _resident_vmem_bytes(tm, Dp, Hp, isz, osz):
    return (2 * tm * Dp * isz                 # x tiles (double-buffered)
            + 2 * (Dp * Hp + 8 * Hp) * isz    # W1 + b1 (conservative 2x bufs)
            + 2 * (Hp * Dp + 8 * Dp) * isz    # W2 + b2
            + 2 * tm * Dp * osz               # out tiles
            + 3 * tm * Hp * 4)                # f32 h + GELU temporaries


def _streamed_vmem_bytes(tm, Dp, th, isz, osz, needs_scratch):
    return (2 * tm * Dp * isz                 # x tiles
            + 2 * (Dp * th + 8 * th) * isz    # W1 slab + b1 slab
            + 2 * (th * Dp + 8 * Dp) * isz    # W2 slab + b2
            + 2 * tm * Dp * osz               # out tiles
            + (tm * Dp * 4 if needs_scratch else 0)   # f32 accumulator scratch
            + 3 * tm * th * 4)                # f32 h + GELU temporaries


def _pick_hidden_slab(Hp128, target_th):
    """Slab size th (multiple of 128) such that n_slabs * th barely covers Hp128."""
    target_th = max(128, _round_up(min(target_th, Hp128), 128))
    n_slabs = max(1, -(-Hp128 // target_th))
    th = _round_up(-(-Hp128 // n_slabs), 128)
    return th, n_slabs * th


# ------------------------------ wrapper --------------------------------------

def feed_forward(x, w1, b1, w2, b2, *, tile_m=None, tile_h=None,
                 use_tanh_gelu=None, force_streamed=False):
    """x: (batch, seq, D); w1: (D, H); b1: (H,); w2: (H, D); b2: (D,).
    Returns (batch, seq, D). Dropout is inference-mode identity."""
    batch, seq, dim = x.shape
    hidden = w1.shape[1]
    dtype = x.dtype
    M = batch * seq
    isz = jnp.dtype(dtype).itemsize
    osz = isz

    gen, phys_vmem = _chip_info()
    cap = _vmem_cap(phys_vmem)
    if use_tanh_gelu is None:
        # v6e/v7x: exact erf is a long VALU polynomial that becomes the binding
        # slot under the fast MXU; tanh lands on the otherwise-idle EUP.
        # v5e's slower MXU hides erf, so keep exact there (and when unknown).
        use_tanh_gelu = gen >= 6

    Dp = _round_up(dim, 128)
    Hp128 = _round_up(hidden, 128)
    needs_scratch = jnp.dtype(dtype) != jnp.dtype(jnp.float32)

    # Row tile: large & lane-dense. Streamed-path AI ~ tm FLOP/byte, so default
    # tm=512 to sit at/above the v5e/v6e/v7x ridges.
    tm_req = 512 if tile_m is None else tile_m
    tm = max(16, min(_round_up(tm_req, 16), _round_up(M, 16)))

    # ---- path selection ------------------------------------------------------
    resident = False
    th = None
    if not force_streamed:
        tm_r = tm
        while True:
            if _resident_vmem_bytes(tm_r, Dp, Hp128, isz, osz) <= 0.85 * cap:
                resident = True
                tm = tm_r
                break
            if tm_r <= 64:
                break
            tm_r = max(64, tm_r // 2)

    if resident:
        Hp = Hp128
    else:
        th_req = 1024 if tile_h is None else tile_h
        th, Hp = _pick_hidden_slab(Hp128, th_req)
        while _streamed_vmem_bytes(tm, Dp, th, isz, osz, needs_scratch) > 0.85 * cap:
            if th > 128:
                th, Hp = _pick_hidden_slab(Hp128, th // 2)
            elif tm > 64:
                tm = max(64, tm // 2)
            else:
                break

    Mp = _round_up(M, tm)

    # ---- padding (zero padding is exact: GELU(0)=0, zero rows/cols add 0) ---
    # Skipped entirely when shapes are already aligned; callers with static
    # weights should pre-pad once outside the per-call path.
    x2 = x.reshape(M, dim)
    if (Mp, Dp) != (M, dim):
        x2 = jnp.pad(x2, ((0, Mp - M), (0, Dp - dim)))
    w1p = w1 if (Dp, Hp) == (dim, hidden) else jnp.pad(
        w1, ((0, Dp - dim), (0, Hp - hidden)))
    b1p = (b1 if Hp == hidden else jnp.pad(b1, (0, Hp - hidden))).reshape(1, Hp)
    w2p = w2 if (Hp, Dp) == (hidden, dim) else jnp.pad(
        w2, ((0, Hp - hidden), (0, Dp - dim)))
    b2p = (b2 if Dp == dim else jnp.pad(b2, (0, Dp - dim))).reshape(1, Dp)

    # ---- VMEM limit & cost estimate ------------------------------------------
    if resident:
        est = _resident_vmem_bytes(tm, Dp, Hp, isz, osz)
        weight_reads = 1
    else:
        est = _streamed_vmem_bytes(tm, Dp, th, isz, osz, needs_scratch)
        weight_reads = Mp // tm          # streamed path re-reads weights per row tile
    vmem_limit = int(min(cap, max(16 * _MiB, est * 1.3 + 2 * _MiB)))

    cost = pl.CostEstimate(
        flops=4 * Mp * Dp * Hp,
        transcendentals=Mp * Hp,
        bytes_accessed=int(isz * (2 * Mp * Dp
                                  + weight_reads * (Dp * Hp + Hp + Hp * Dp)
                                  + Dp)),
    )

    # ---- pallas_call ----------------------------------------------------------
    if resident:
        kernel = functools.partial(_ffn_kernel_resident,
                                   use_tanh_gelu=use_tanh_gelu)
        grid_spec = pltpu.PrefetchScalarGridSpec(
            num_scalar_prefetch=0,
            grid=(Mp // tm,),
            in_specs=[
                pl.BlockSpec((tm, Dp), lambda i: (i, 0)),   # x row tile
                pl.BlockSpec((Dp, Hp), lambda i: (0, 0)),   # W1, resident
                pl.BlockSpec((1, Hp), lambda i: (0, 0)),    # b1, resident
                pl.BlockSpec((Hp, Dp), lambda i: (0, 0)),   # W2, resident
                pl.BlockSpec((1, Dp), lambda i: (0, 0)),    # b2, resident
            ],
            out_specs=pl.BlockSpec((tm, Dp), lambda i: (i, 0)),
            scratch_shapes=[],
        )
        dim_sem = ("parallel",)
    else:
        kernel = functools.partial(_ffn_kernel_streamed,
                                   use_tanh_gelu=use_tanh_gelu)
        scratch = [pltpu.VMEM((tm, Dp), jnp.float32)] if needs_scratch else []
        grid_spec = pltpu.PrefetchScalarGridSpec(
            num_scalar_prefetch=0,
            grid=(Mp // tm, Hp // th),
            in_specs=[
                pl.BlockSpec((tm, Dp), lambda i, k: (i, 0)),   # x row tile
                pl.BlockSpec((Dp, th), lambda i, k: (0, k)),   # W1 slab (streamed)
                pl.BlockSpec((1, th), lambda i, k: (0, k)),    # b1 slab
                pl.BlockSpec((th, Dp), lambda i, k: (k, 0)),   # W2 slab (streamed)
                pl.BlockSpec((1, Dp), lambda i, k: (0, 0)),    # b2 (resident)
            ],
            out_specs=pl.BlockSpec((tm, Dp), lambda i, k: (i, 0)),
            scratch_shapes=scratch,
        )
        dim_sem = ("parallel", "arbitrary")
        # TODO(synk): sweep pipeline_mode=pl.Buffered(3) on the W1/W2 slabs once
        # the streamed path is compute-bound (hides the i-boundary DMA bubble).

    out2 = pl.pallas_call(
        kernel,
        out_shape=jax.ShapeDtypeStruct((Mp, Dp), dtype),
        grid_spec=grid_spec,
        compiler_params=pltpu.CompilerParams(
            dimension_semantics=dim_sem,
            vmem_limit_bytes=vmem_limit,
        ),
        cost_estimate=cost,
    )(x2, w1p, b1p, w2p, b2p)
    # TODO(synk): on v7x, verify "parallel" shards the M axis across both
    # TensorCores; otherwise switch the leading axis to pltpu.CORE_PARALLEL.

    if (Mp, Dp) != (M, dim):
        out2 = out2[:M, :dim]
    return out2.reshape(batch, seq, dim)


# ------------------------------ reference / init ------------------------------

def init_params(key, n_embed, mlp_dim, dtype=jnp.float32):
    """Deterministic init mirroring nn.Linear's default U(-1/sqrt(fan_in), ...)."""
    k1, k2, k3, k4 = jax.random.split(key, 4)
    lim1 = 1.0 / jnp.sqrt(jnp.float32(n_embed))
    lim2 = 1.0 / jnp.sqrt(jnp.float32(mlp_dim))
    w1 = jax.random.uniform(k1, (n_embed, mlp_dim), dtype, -lim1, lim1)
    b1 = jax.random.uniform(k2, (mlp_dim,), dtype, -lim1, lim1)
    w2 = jax.random.uniform(k3, (mlp_dim, n_embed), dtype, -lim2, lim2)
    b2 = jax.random.uniform(k4, (n_embed,), dtype, -lim2, lim2)
    return w1, b1, w2, b2


def _reference(x, w1, b1, w2, b2):
    hi = jax.lax.Precision.HIGHEST
    xf = x.astype(jnp.float32)
    h = jnp.dot(xf, w1.astype(jnp.float32), precision=hi) + b1.astype(jnp.float32)
    h = 0.5 * h * (1.0 + jax.lax.erf(h * jnp.float32(0.7071067811865476)))
    return jnp.dot(h, w2.astype(jnp.float32), precision=hi) + b2.astype(jnp.float32)


if __name__ == "__main__":
    key = jax.random.PRNGKey(0)
    kx, kp, kx2, kp2, kx3, kp3 = jax.random.split(key, 6)

    # --- Small shapes implied by the module (padding + weight-resident path) --
    batch, seq, n_embed, mlp_dim = 2, 8, 32, 64
    x = jax.random.normal(kx, (batch, seq, n_embed), jnp.float32)
    w1, b1, w2, b2 = init_params(kp, n_embed, mlp_dim)

    out = jax.block_until_ready(feed_forward(x, w1, b1, w2, b2,
                                             use_tanh_gelu=False))
    ref = _reference(x, w1, b1, w2, b2)
    assert out.shape == (batch, seq, n_embed)
    assert jnp.allclose(out, ref, atol=1e-4, rtol=1e-4), "small-shape mismatch"

    # --- Moderate shapes: weight-resident fast path (default selection) -------
    B2, S2, D2, H2 = 4, 128, 256, 1024
    x_big = jax.random.normal(kx2, (B2, S2, D2), jnp.float32)
    p_big = init_params(kp2, D2, H2)
    out_res = jax.block_until_ready(feed_forward(x_big, *p_big,
                                                 use_tanh_gelu=False))
    ref_big = _reference(x_big, *p_big)
    assert jnp.allclose(out_res, ref_big, atol=5e-3, rtol=5e-3), "resident mismatch"

    # --- Same data, forced streamed path (multi row-tile x multi H-slab,
    #     f32 accumulation directly into the output ref) ----------------------
    out_str = jax.block_until_ready(
        feed_forward(x_big, *p_big, tile_m=256, tile_h=512,
                     use_tanh_gelu=False, force_streamed=True))
    assert jnp.allclose(out_str, ref_big, atol=5e-3, rtol=5e-3), "streamed mismatch"

    # --- Odd (non-multiple-of-128) dims through the streamed path -------------
    B3, S3, D3, H3 = 2, 50, 96, 300
    x_odd = jax.random.normal(kx3, (B3, S3, D3), jnp.float32)
    p_odd = init_params(kp3, D3, H3)
    out_odd = jax.block_until_ready(
        feed_forward(x_odd, *p_odd, tile_m=64, tile_h=128,
                     use_tanh_gelu=False, force_streamed=True))
    ref_odd = _reference(x_odd, *p_odd)
    assert jnp.allclose(out_odd, ref_odd, atol=1e-4, rtol=1e-4), "odd-dims mismatch"

    # --- bf16 activations/weights, streamed path with f32 scratch accumulator -
    x_bf = x_big.astype(jnp.bfloat16)
    p_bf = tuple(p.astype(jnp.bfloat16) for p in p_big)
    out_bf = jax.block_until_ready(
        feed_forward(x_bf, *p_bf, tile_m=256, tile_h=512,
                     use_tanh_gelu=False, force_streamed=True))
    assert out_bf.dtype == jnp.bfloat16
    bf_err = jnp.max(jnp.abs(out_bf.astype(jnp.float32) - ref_big))
    assert bf_err < 0.1, f"bf16 error too large: {bf_err}"

    # --- Auto GELU selection (tanh on v6e/v7x, exact erf elsewhere) -----------
    out_auto = jax.block_until_ready(feed_forward(x_big, *p_big))
    auto_err = jnp.max(jnp.abs(out_auto - ref_big))
    assert auto_err < 5e-2, f"auto-GELU error too large: {auto_err}"

    print("KERNEL_OK")
</pallas_src>

<mosaic_0001>
module attributes {stable_mosaic.version = 11 : i64} {
  func.func @_ffn_kernel_resident(%arg0: i32, %arg1: memref<16x128xf32, #tpu.memory_space<vmem>>, %arg2: memref<128x128xf32, #tpu.memory_space<vmem>>, %arg3: memref<1x128xf32, #tpu.memory_space<vmem>>, %arg4: memref<128x128xf32, #tpu.memory_space<vmem>>, %arg5: memref<1x128xf32, #tpu.memory_space<vmem>>, %arg6: memref<16x128xf32, #tpu.memory_space<vmem>>) attributes {dimension_semantics = [#tpu.dimension_semantics<parallel>], iteration_bounds = array<i64: 1>, scalar_prefetch = 0 : i64, scratch_operands = 0 : i64, tpu.core_type = #tpu.core_type<tc>, window_params = [{transform_indices = @transform_0, window_bounds = array<i64: 16, 128>}, {pipeline_mode = #tpu.pipeline_mode<synchronous>, transform_indices = @transform_1, window_bounds = array<i64: 128, 128>}, {pipeline_mode = #tpu.pipeline_mode<synchronous>, transform_indices = @transform_2, window_bounds = array<i64: 1, 128>}, {pipeline_mode = #tpu.pipeline_mode<synchronous>, transform_indices = @transform_3, window_bounds = array<i64: 128, 128>}, {pipeline_mode = #tpu.pipeline_mode<synchronous>, transform_indices = @transform_4, window_bounds = array<i64: 1, 128>}, {transform_indices = @transform_5, window_bounds = array<i64: 16, 128>}]} {
    %c0 = arith.constant 0 : index
    %c0_0 = arith.constant 0 : index
    %0 = vector.load %arg1[%c0, %c0_0] : memref<16x128xf32, #tpu.memory_space<vmem>>, vector<16x128xf32>
    %c0_1 = arith.constant 0 : index
    %c0_2 = arith.constant 0 : index
    %1 = vector.load %arg2[%c0_1, %c0_2] : memref<128x128xf32, #tpu.memory_space<vmem>>, vector<128x128xf32>
    %cst = arith.constant dense<0.000000e+00> : vector<16x128xf32>
    %2 = tpu.matmul %0, %1, %cst {dimension_numbers = #tpu.dot_dimension_numbers<[1], [0], [0], [1], [0, 0, 1, 1], [], []>} : vector<16x128xf32>, vector<128x128xf32>, vector<16x128xf32> -> vector<16x128xf32>
    %c0_3 = arith.constant 0 : index
    %c0_4 = arith.constant 0 : index
    %3 = vector.load %arg3[%c0_3, %c0_4] : memref<1x128xf32, #tpu.memory_space<vmem>>, vector<1x128xf32>
    %4 = vector.broadcast %3 : vector<1x128xf32> to vector<16x128xf32>
    %5 = arith.addf %2, %4 : vector<16x128xf32>
    %cst_5 = arith.constant 5.000000e-01 : f32
    %6 = vector.broadcast %cst_5 : f32 to vector<16x128xf32>
    %7 = arith.mulf %6, %5 : vector<16x128xf32>
    %cst_6 = arith.constant 0.707106769 : f32
    %8 = vector.broadcast %cst_6 : f32 to vector<16x128xf32>
    %9 = arith.mulf %5, %8 : vector<16x128xf32>
    %10 = math.erf %9 : vector<16x128xf32>
    %cst_7 = arith.constant 1.000000e+00 : f32
    %11 = vector.broadcast %cst_7 : f32 to vector<16x128xf32>
    %12 = arith.addf %11, %10 : vector<16x128xf32>
    %13 = arith.mulf %7, %12 : vector<16x128xf32>
    %c0_8 = arith.constant 0 : index
    %c0_9 = arith.constant 0 : index
    %14 = vector.load %arg4[%c0_8, %c0_9] : memref<128x128xf32, #tpu.memory_space<vmem>>, vector<128x128xf32>
    %cst_10 = arith.constant dense<0.000000e+00> : vector<16x128xf32>
    %15 = tpu.matmul %13, %14, %cst_10 {dimension_numbers = #tpu.dot_dimension_numbers<[1], [0], [0], [1], [0, 0, 1, 1], [], []>} : vector<16x128xf32>, vector<128x128xf32>, vector<16x128xf32> -> vector<16x128xf32>
    %c0_11 = arith.constant 0 : index
    %c0_12 = arith.constant 0 : index
    %16 = vector.load %arg5[%c0_11, %c0_12] : memref<1x128xf32, #tpu.memory_space<vmem>>, vector<1x128xf32>
    %17 = vector.broadcast %16 : vector<1x128xf32> to vector<16x128xf32>
    %18 = arith.addf %15, %17 : vector<16x128xf32>
    %c0_13 = arith.constant 0 : index
    %c0_14 = arith.constant 0 : index
    %19 = vector.load %arg6[%c0_13, %c0_14] : memref<16x128xf32, #tpu.memory_space<vmem>>, vector<16x128xf32>
    tpu.vector_store %arg6[%c0_13, %c0_14], %18 {strides = array<i32>} : memref<16x128xf32, #tpu.memory_space<vmem>>, vector<16x128xf32>,
    return
  }
  func.func @transform_0(%arg0: i32) -> (i32, i32) {
    %c0_i32 = arith.constant 0 : i32
    %c0_i32_0 = arith.constant 0 : i32
    return %arg0, %c0_i32 : i32, i32
  }
  func.func @transform_1(%arg0: i32) -> (i32, i32) {
    %c0_i32 = arith.constant 0 : i32
    %c0_i32_0 = arith.constant 0 : i32
    %c0_i32_1 = arith.constant 0 : i32
    return %c0_i32, %c0_i32_0 : i32, i32
  }
  func.func @transform_2(%arg0: i32) -> (i32, i32) {
    %c0_i32 = arith.constant 0 : i32
    %c0_i32_0 = arith.constant 0 : i32
    %c0_i32_1 = arith.constant 0 : i32
    return %c0_i32, %c0_i32_0 : i32, i32
  }
  func.func @transform_3(%arg0: i32) -> (i32, i32) {
    %c0_i32 = arith.constant 0 : i32
    %c0_i32_0 = arith.constant 0 : i32
    %c0_i32_1 = arith.constant 0 : i32
    return %c0_i32, %c0_i32_0 : i32, i32
  }
  func.func @transform_4(%arg0: i32) -> (i32, i32) {
    %c0_i32 = arith.constant 0 : i32
    %c0_i32_0 = arith.constant 0 : i32
    %c0_i32_1 = arith.constant 0 : i32
    return %c0_i32, %c0_i32_0 : i32, i32
  }
  func.func @transform_5(%arg0: i32) -> (i32, i32) {
    %c0_i32 = arith.constant 0 : i32
    %c0_i32_0 = arith.constant 0 : i32
    return %arg0, %c0_i32 : i32, i32
  }
}

</mosaic_0001>

<bundles_post_ra>
// kernel: tpu_custom_call.1
= control target key start
LH: loop header
LB: loop body
LE: loop exit
PB: predicated region body
PF: predicated region fallthrough
CT: control target
= control target key end

     0   :  { %10 = vsyncpa [#allocation3], 0  ;;  %s510_s0 = inlined_call_operand.hbm [shape: f32[16,128], index: 0, kind: input, shape index: {}]   ;;  %s511_s1 = inlined_call_operand.hbm [shape: f32[128,128], index: 1, kind: input, shape index: {}]   ;;  %s512_s2 = inlined_call_operand.vmem [shape: f32[1,128], index: 2, kind: input, shape index: {}]   ;;  %s513_s3 = inlined_call_operand.hbm [shape: f32[128,128], index: 3, kind: input, shape index: {}]   ;;  %s514_s4 = inlined_call_operand.vmem [shape: f32[1,128], index: 4, kind: input, shape index: {}]   ;;  %s515_s5 = inlined_call_operand.hbm [shape: f32[16,128], index: 5, kind: output, shape index: {}]  }
   0x1   :  { %11 = vsyncpa [#allocation6], 0 }
   0x2   :  { %12 = vsyncpa [#allocation4], 0  ;;  %s30_s20 = sshll.u32 %s511_s1, 4  ;;  %s414_s21 = smov [#allocation5]   ;;  %s31_s20 = int_to_ptr.hbm [resolvable:$true] %s30_s20 }
   0x3   :  { %s32_s22 = sshll.u32 %s414_s21, 4  ;;  %s17_s25 = sshll.u32 %s510_s0, 4  ;;  %s33_s22 = int_to_ptr.vmem [resolvable:$true] %s32_s22  ;;  %s18_s25 = int_to_ptr.hbm [resolvable:$true] %s17_s25 }
   0x4   :  { %s415_s26 = smov 128   ;;  %s416_s27 = smov 8  }
   0x5   :  { %38 = dma.hbm_to_vmem [thread:$0]  %s31_s20, 2048, %s33_s22, [#allocation6], %s415_s26, %s415_s26, %s416_s27  }
   0x6   :  { %s417_s28 = smov [#allocation2]   ;;  %s45_s1 = sshll.u32 %s513_s3, 4  ;;  %s46_s1 = int_to_ptr.hbm [resolvable:$true] %s45_s1 }
   0x7   :  { %s19_s29 = sshll.u32 %s417_s28, 4  ;;  %s418_s0 = smov [#allocation7]   ;;  %s20_s29 = int_to_ptr.vmem [resolvable:$true] %s19_s29 }
   0x8   :  { %25 = dma.hbm_to_vmem [thread:$0]  %s18_s25, 256, %s20_s29, [#allocation3], %s415_s26, %s415_s26, %s416_s27  }
   0x9   :  { %s47_s7 = sshll.u32 %s418_s0, 4  ;;  %s48_s7 = int_to_ptr.vmem [resolvable:$true] %s47_s7 }
   0xa   :  { %53 = dma.hbm_to_vmem [thread:$0]  %s46_s1, 2048, %s48_s7, [#allocation6], %s415_s26, %s415_s26, %s416_s27  }
   0xb   :  { %408 = dma.done.wait [#allocation3], 256  }
   0xc   :  { %409 = vsyncadd [#allocation3], 4294967040 }
   0xd   :  { %410 = dma.done.wait [#allocation6], 4096  }
   0xe   :  { %411 = vsyncadd [#allocation6], 4294963200  ;;  %v85_v0 = vld [vmem:[#allocation5 + $0x78] sm:$0xff]  ;;  %v84_v1 = vld [vmem:[#allocation5 + $0x70] sm:$0xff]  ;;  %s419_s10 = smov [#allocation8]   ;;  %s252_s14 = sshll.u32 %s515_s5, 4  ;;  %s253_s14 = int_to_ptr.hbm [resolvable:$true] %s252_s14 }
   0xf   :  { %90 = vmatpush.msra.mxu0 %v85_v0  ;;  %268 = vmatpush.msra.mxu2 %v85_v0  ;;  %v83_v2 = vld [vmem:[#allocation5 + $0x68] sm:$0xff]  ;;  %v82_v3 = vld [vmem:[#allocation5 + $0x60] sm:$0xff]  ;;  %v81_v4 = vld [vmem:[#allocation5 + $0x58] sm:$0xff]  ;;  %s250_s11 = sshll.u32 %s419_s10, 4  ;;  %s251_s11 = int_to_ptr.vmem [resolvable:$true] %s250_s11 }
  0x10   :  { %v80_v5 = vld [vmem:[#allocation5 + $0x50] sm:$0xff]  ;;  %v79_v6 = vld [vmem:[#allocation5 + $0x48] sm:$0xff]  ;;  %v78_v7 = vld [vmem:[#allocation5 + $0x40] sm:$0xff] }
  0x11   :  { %91 = vmatpush.msra.mxu0 %v84_v1  ;;  %269 = vmatpush.msra.mxu2 %v84_v1  ;;  %v77_v8 = vld [vmem:[#allocation5 + $0x38] sm:$0xff]  ;;  %v76_v9 = vld [vmem:[#allocation5 + $0x30] sm:$0xff]  ;;  %v75_v10 = vld [vmem:[#allocation5 + $0x28] sm:$0xff] }
  0x12   :  { %v74_v11 = vld [vmem:[#allocation5 + $0x20] sm:$0xff]  ;;  %v73_v12 = vld [vmem:[#allocation5 + $0x18] sm:$0xff]  ;;  %v72_v13 = vld [vmem:[#allocation5 + $0x10] sm:$0xff] }
  0x13   :  { %92 = vmatpush.msra.mxu0 %v83_v2  ;;  %270 = vmatpush.msra.mxu2 %v83_v2  ;;  %v71_v14 = vld [vmem:[#allocation5 + $0x8] sm:$0xff]  ;;  %v70_v15 = vld [vmem:[#allocation5] sm:$0xff]  ;;  %v68_v16 = vld [vmem:[#allocation2] sm:$0xff] }
  0x14   :  { %v69_v17 = vld [vmem:[#allocation2 + $0x8] sm:$0xff]  ;;  %v215_v19 = vld [vmem:[#allocation7 + $0x70] sm:$0xff]  ;;  %v214_v20 = vld [vmem:[#allocation7 + $0x68] sm:$0xff] }
  0x15   :  { %93 = vmatpush.msra.mxu0 %v82_v3  ;;  %271 = vmatpush.msra.mxu2 %v82_v3  ;;  %v216_v18 = vld [vmem:[#allocation7 + $0x78] sm:$0xff]  ;;  %v213_v21 = vld [vmem:[#allocation7 + $0x60] sm:$0xff]  ;;  %v306_v22 = vld [vmem:[%s512_s2] ss:$0 sm:$0xff] }
  0x16   :  { %221 = vmatpush.msra.mxu1 %v216_v18  ;;  %284 = vmatpush.msra.mxu3 %v216_v18  ;;  %v212_v23 = vld [vmem:[#allocation7 + $0x58] sm:$0xff]  ;;  %v211_v25 = vld [vmem:[#allocation7 + $0x50] sm:$0xff]  ;;  %v210_v27 = vld [vmem:[#allocation7 + $0x48] sm:$0xff] }
  0x17   :  { %94 = vmatpush.msra.mxu0 %v81_v4  ;;  %272 = vmatpush.msra.mxu2 %v81_v4  ;;  %v209_v29 = vld [vmem:[#allocation7 + $0x40] sm:$0xff]  ;;  %v208_v30 = vld [vmem:[#allocation7 + $0x38] sm:$0xff]  ;;  %v207_v33 = vld [vmem:[#allocation7 + $0x30] sm:$0xff] }
  0x18   :  { %222 = vmatpush.msra.mxu1 %v215_v19  ;;  %285 = vmatpush.msra.mxu3 %v215_v19  ;;  %v206_v36 = vld [vmem:[#allocation7 + $0x28] sm:$0xff]  ;;  %v205_v39 = vld [vmem:[#allocation7 + $0x20] sm:$0xff]  ;;  %v204_v43 = vld [vmem:[#allocation7 + $0x18] sm:$0xff] }
  0x19   :  { %95 = vmatpush.msra.mxu0 %v80_v5  ;;  %273 = vmatpush.msra.mxu2 %v80_v5  ;;  %v203_v47 = vld [vmem:[#allocation7 + $0x10] sm:$0xff]  ;;  %v202_v52 = vld [vmem:[#allocation7 + $0x8] sm:$0xff]  ;;  %v201_v56 = vld [vmem:[#allocation7] sm:$0xff] }
  0x1a   :  { %223 = vmatpush.msra.mxu1 %v214_v20  ;;  %286 = vmatpush.msra.mxu3 %v214_v20 }
  0x1b   :  { %96 = vmatpush.msra.mxu0 %v79_v6  ;;  %274 = vmatpush.msra.mxu2 %v79_v6 }
  0x1c   :  { %224 = vmatpush.msra.mxu1 %v213_v21  ;;  %287 = vmatpush.msra.mxu3 %v213_v21 }
  0x1d   :  { %97 = vmatpush.msra.mxu0 %v78_v7  ;;  %275 = vmatpush.msra.mxu2 %v78_v7 }
  0x1e   :  { %225 = vmatpush.msra.mxu1 %v212_v23  ;;  %288 = vmatpush.msra.mxu3 %v212_v23 }
  0x1f   :  { %98 = vmatpush.msra.mxu0 %v77_v8  ;;  %276 = vmatpush.msra.mxu2 %v77_v8 }
  0x20   :  { %226 = vmatpush.msra.mxu1 %v211_v25  ;;  %289 = vmatpush.msra.mxu3 %v211_v25 }
  0x21   :  { %99 = vmatpush.msra.mxu0 %v76_v9  ;;  %277 = vmatpush.msra.mxu2 %v76_v9 }
  0x22   :  { %227 = vmatpush.msra.mxu1 %v210_v27  ;;  %290 = vmatpush.msra.mxu3 %v210_v27 }
  0x23   :  { %100 = vmatpush.msra.mxu0 %v75_v10  ;;  %278 = vmatpush.msra.mxu2 %v75_v10 }
  0x24   :  { %228 = vmatpush.msra.mxu1 %v209_v29  ;;  %291 = vmatpush.msra.mxu3 %v209_v29 }
  0x25   :  { %101 = vmatpush.msra.mxu0 %v74_v11  ;;  %279 = vmatpush.msra.mxu2 %v74_v11 }
  0x26   :  { %229 = vmatpush.msra.mxu1 %v208_v30  ;;  %292 = vmatpush.msra.mxu3 %v208_v30 }
  0x27   :  { %102 = vmatpush.msra.mxu0 %v73_v12  ;;  %280 = vmatpush.msra.mxu2 %v73_v12 }
  0x28   :  { %230 = vmatpush.msra.mxu1 %v207_v33  ;;  %293 = vmatpush.msra.mxu3 %v207_v33 }
  0x29   :  { %103 = vmatpush.msra.mxu0 %v72_v13  ;;  %281 = vmatpush.msra.mxu2 %v72_v13 }
  0x2a   :  { %231 = vmatpush.msra.mxu1 %v206_v36  ;;  %294 = vmatpush.msra.mxu3 %v206_v36 }
  0x2b   :  { %104 = vmatpush.msra.mxu0 %v71_v14  ;;  %282 = vmatpush.msra.mxu2 %v71_v14 }
  0x2c   :  { %232 = vmatpush.msra.mxu1 %v205_v39  ;;  %295 = vmatpush.msra.mxu3 %v205_v39 }
  0x2d   :  { %105 = vmatpush.msra.mxu0 %v70_v15  ;;  %283 = vmatpush.msra.mxu2 %v70_v15 }
  0x2e   :  { %106 = vmatmul.f32.vlgmr.msra.gmra.mxu0 %v68_v16  ;;  %109 = vmatmul.f32.vlgmr.msra.gmra.mxu2 %v69_v17 }
  0x2f   :  { %233 = vmatpush.msra.mxu1 %v204_v43  ;;  %296 = vmatpush.msra.mxu3 %v204_v43 }
  0x31   :  { %234 = vmatpush.msra.mxu1 %v203_v47  ;;  %297 = vmatpush.msra.mxu3 %v203_v47 }
  0x33   :  { %235 = vmatpush.msra.mxu1 %v202_v52  ;;  %298 = vmatpush.msra.mxu3 %v202_v52 }
  0x35   :  { %236 = vmatpush.msra.mxu1 %v201_v56  ;;  %299 = vmatpush.msra.mxu3 %v201_v56  ;;  %v307_v56 = vld [vmem:[%s514_s4] ss:$0 sm:$0xff] }
  0xab   :  { %v107_v24 = vpop.f32.mrf.mxu0 }
  0xac   :  { %v471_v26 = vadd.f32 %v306_v22, %v107_v24 }
  0xae   :  { %v474_v28 = vmul.f32 0.70710677, %v471_v26  ;;  %v113_v47 = vmul.f32 0.5, %v471_v26 }
  0xb0   :  { %v117_v31 = vmul.f32 %v474_v28, %v474_v28 }
  0xb1   :  { %v110_v32 = vpop.f32.mrf.mxu2 }
  0xb2   :  { %v478_v34 = vmin.f32 %v117_v31, 16.0  ;;  %v480_v35 = vadd.f32 %v306_v22, %v110_v32 }
  0xb4   :  { %v119_v37 = vmul.f32 2.1237322e-06, %v478_v34  ;;  %v484_v38 = vmul.f32 0.70710677, %v480_v35  ;;  %v130_v40 = vmul.f32 3.8918573e-05, %v478_v34 }
  0xb6   :  { %v120_v41 = vadd.f32 0.00028619796, %v119_v37  ;;  %v157_v42 = vmul.f32 %v484_v38, %v484_v38  ;;  %v131_v44 = vadd.f32 0.001143296, %v130_v40 }
  0xb8   :  { %v121_v45 = vmul.f32 %v120_v41, %v478_v34  ;;  %v158_v46 = vmin.f32 %v157_v42, 16.0  ;;  %v132_v48 = vmul.f32 %v131_v44, %v478_v34 }
  0xba   :  { %v159_v49 = vmul.f32 2.1237322e-06, %v158_v46  ;;  %v170_v50 = vmul.f32 3.8918573e-05, %v158_v46  ;;  %v122_v51 = vadd.f32 0.0036580483, %v121_v45 }
  0xbb   :  { %v133_v53 = vadd.f32 0.014752088, %v132_v48 }
  0xbc   :  { %v160_v54 = vadd.f32 0.00028619796, %v159_v49  ;;  %v171_v55 = vadd.f32 0.001143296, %v170_v50  ;;  %v123_v60 = vmul.f32 %v122_v51, %v478_v34 }
  0xbd   :  { %v134_v57 = vmul.f32 %v133_v53, %v478_v34  ;;  %v114_v53 = vmul.f32 0.5, %v480_v35 }
  0xbe   :  { %v161_v58 = vmul.f32 %v160_v54, %v158_v46  ;;  %v172_v59 = vmul.f32 %v171_v55, %v158_v46  ;;  %v124_v2 = vadd.f32 0.05243302, %v123_v60 }
  0xbf   :  { %v135_v61 = vadd.f32 0.112945676, %v134_v57 }
  0xc0   :  { %v162_v62 = vadd.f32 0.0036580483, %v161_v58  ;;  %v173_v63 = vadd.f32 0.014752088, %v172_v59  ;;  %v125_v8 = vmul.f32 %v124_v2, %v478_v34 }
  0xc1   :  { %v136_v0 = vmul.f32 %v135_v61, %v478_v34 }
  0xc2   :  { %v174_v1 = vmul.f32 %v173_v63, %v158_v46  ;;  %v163_v4 = vmul.f32 %v162_v62, %v158_v46  ;;  %v126_v13 = vadd.f32 0.18741608, %v125_v8 }
  0xc3   :  { %v137_v3 = vadd.f32 0.4994258, %v136_v0 }
  0xc4   :  { %v175_v5 = vadd.f32 0.112945676, %v174_v1  ;;  %v164_v10 = vadd.f32 0.05243302, %v163_v4  ;;  %v127_v17 = vmul.f32 %v126_v13, %v478_v34 }
  0xc5   :  { %v138_v6 = vmul.f32 %v137_v3, %v478_v34 }
  0xc6   :  { %v176_v7 = vmul.f32 %v175_v5, %v158_v46  ;;  %v165_v14 = vmul.f32 %v164_v10, %v158_v46  ;;  %v128_v21 = vadd.f32 1.1283791, %v127_v17 }
  0xc7   :  { %v139_v9 = vadd.f32 1.0, %v138_v6 }
  0xc8   :  { %v177_v11 = vadd.f32 0.4994258, %v176_v7  ;;  %v166_v18 = vadd.f32 0.18741608, %v165_v14  ;;  %v129_v31 = vmul.f32 %v128_v21, %v474_v28 }
  0xc9   :  { %308 = vrcp.f32 %v139_v9  ;;  %v151_v22 = vand.u32 2147483648, %v139_v9  ;;  %v149_v27 = vand.u32 2147483647, %v139_v9  ;;  %vm145_vm1 = vweird.f32 %v139_v9 }
  0xca   :  { %v178_v12 = vmul.f32 %v177_v11, %v158_v46  ;;  %v167_v24 = vmul.f32 %v166_v18, %v158_v46 }
  0xcb   :  { %v152_v32 = vor.u32 1.1754944e-38, %v151_v22  ;;  %vm150_vm3 = vcmp.eq.f32.partialorder %v149_v27, 8.507059e+37 }
  0xcc   :  { %v179_v15 = vadd.f32 1.0, %v178_v12  ;;  %v168_v36 = vadd.f32 1.1283791, %v167_v24 }
  0xce   :  { %310 = vrcp.f32 %v179_v15  ;;  %v191_v37 = vand.u32 2147483648, %v179_v15  ;;  %v189_v41 = vand.u32 2147483647, %v179_v15  ;;  %vm185_vm5 = vweird.f32 %v179_v15 }
  0xcf   :  { %v309_v16 = vpop.eup %308  ;;  %v169_v46 = vmul.f32 %v168_v36, %v484_v38 }
  0xd0   :  { %v141_v19 = vmul.f32 %v309_v16, %v139_v9  ;;  %vm146_vm0 = vweird.f32 %v309_v16  ;;  %v192_v45 = vor.u32 1.1754944e-38, %v191_v37  ;;  %vm190_vm7 = vcmp.eq.f32.partialorder %v189_v41, 8.507059e+37 }
  0xd1   :  { %vm147_vm2 = vmor %vm145_vm1, %vm146_vm0 }
  0xd2   :  { %v142_v20 = vsub.f32 1.0, %v141_v19 }
  0xd4   :  { %v311_v23 = vpop.eup %310  ;;  %v143_v25 = vmul.f32 %v309_v16, %v142_v20 }
  0xd5   :  { %v181_v29 = vmul.f32 %v311_v23, %v179_v15  ;;  %vm186_vm4 = vweird.f32 %v311_v23 }
  0xd6   :  { %v144_v30 = vadd.f32 %v309_v16, %v143_v25  ;;  %vm187_vm6 = vmor %vm185_vm5, %vm186_vm4 }
  0xd7   :  { %v182_v33 = vsub.f32 1.0, %v181_v29 }
  0xd8   :  { %v148_v34 = vsel %vm147_vm2, %v309_v16, %v144_v30 }
  0xd9   :  { %v153_v39 = vsel %vm150_vm3, %v152_v32, %v148_v34  ;;  %v183_v40 = vmul.f32 %v311_v23, %v182_v33 }
  0xda   :  { %v154_v42 = vmul.f32 %v153_v39, %v129_v31 }
  0xdb   :  { %v184_v43 = vadd.f32 %v311_v23, %v183_v40 }
  0xdc   :  { %v266_v44 = vclamps-f32 %v154_v42, 1.0 }
  0xdd   :  { %v188_v28 = vsel %vm187_vm6, %v311_v23, %v184_v43 }
  0xde   :  { %v197_v48 = vadd.f32 1.0, %v266_v44  ;;  %v193_v49 = vsel %vm190_vm7, %v192_v45, %v188_v28 }
  0xdf   :  { %v194_v50 = vmul.f32 %v193_v49, %v169_v46 }
  0xe0   :  { %v199_v51 = vmul.f32 %v197_v48, %v113_v47 }
  0xe1   :  { %v267_v52 = vclamps-f32 %v194_v50, 1.0 }
  0xe2   :  { %237 = vmatmul.f32.vlgmr.msra.gmra.mxu1 %v199_v51 }
  0xe3   :  { %v198_v54 = vadd.f32 1.0, %v267_v52 }
  0xe5   :  { %v200_v55 = vmul.f32 %v198_v54, %v114_v53 }
  0xe7   :  { %240 = vmatmul.f32.vlgmr.msra.gmra.mxu3 %v200_v55 }
 0x15f   :  { %v238_v38 = vpop.f32.mrf.mxu1 }
 0x160   :  { %v239_v57 = vadd.f32 %v307_v56, %v238_v38 }
 0x162   :  { %244 = vst [vmem:[#allocation8] sm:$0xff] %v239_v57 }
 0x16a   :  { %v241_v26 = vpop.f32.mrf.mxu3 }
 0x16b   :  { %v242_v58 = vadd.f32 %v307_v56, %v241_v26 }
 0x16d   :  { %245 = vst [vmem:[#allocation8 + $0x8] sm:$0xff] %v242_v58 }
 0x16e   :  { %258 = dma.vmem_to_hbm [thread:$0]  %s251_s11, 256, %s253_s14, [#allocation4], %s415_s26, %s415_s26, %s416_s27  }
 0x16f   :  { %412 = dma.done.wait [#allocation4], 256  }
 0x170   :  { %413 = vsyncadd [#allocation4], 4294967040 }
 0x171   :  { %263 = vsyncpa [#allocation3], 1 }
 0x172   :  { %264 = vsyncpa [#allocation6], 1 }
 0x173   :  { %265 = vsyncpa [#allocation4], 1 }

</bundles_post_ra>
